<compile_context>
chip_gen: v7x
topology: tpu7x:2x2x1
jax: 0.10.0
libtpu: 0.0.40
codegen_flags: <defaults>
</compile_context>

<pallas_src>
import math

import jax
import jax.numpy as jnp
from jax.experimental import pallas as pl
from jax.experimental.pallas import tpu as pltpu


def _round_up(x, m):
    return -(-x // m) * m


def _cls_token_kernel(obs_ref, tok_ref, out_ref):
    # obs_ref: (TB, C, S)   tok_ref: (C, 1)   out_ref: (TB, C, S + 1)
    tb, c, s = obs_ref.shape
    # Bulk copy: lanes [0, S) are 128-aligned full-vreg stores when S % 128 == 0.
    out_ref[:, :, :s] = obs_ref[...]
    # Token column: single masked-lane store, token broadcast over the batch tile.
    out_ref[:, :, s:] = jnp.broadcast_to(tok_ref[...].reshape(1, c, 1), (tb, c, 1))


def cls_token_forward(obs, token):
    """obs: (B, C, *spatial) channels-first. token: (C, 1). Returns (B, C, S+1)."""
    assert obs.ndim >= 3, "expected (B, C, *spatial)"
    B, C = obs.shape[0], obs.shape[1]
    spatial = obs.shape[2:]
    S = math.prod(spatial)
    dtype = obs.dtype

    # Wrapper glue: flatten spatial dims (no-op when obs is already (B, C, S)).
    obs3 = obs.reshape(B, C, S)
    # Output dtype follows the activation dtype (token cast once; intentional).
    tok = token.astype(dtype).reshape(C, 1)

    itemsize = jnp.dtype(dtype).itemsize
    # Layout-aware per-batch VMEM footprint: lane-pad widths to 128, sublane-pad
    # the channel dim to the packed-sublane multiple for this dtype.
    sublane_mult = max(8, 32 // itemsize)          # f32:8, bf16:16, int8/fp8:32
    lanes_in = _round_up(S, 128)
    lanes_out = _round_up(S + 1, 128)
    c_rows = _round_up(C, sublane_mult)
    bytes_per_b = c_rows * (lanes_in + lanes_out) * itemsize

    # Conservative budget that stays under every generation's scoped-VMEM
    # default (v5e 16 MiB / v6e 32 MiB / v7x 32 MiB, 64 MiB physical); the
    # factor of 2 accounts for default double-buffering of in + out tiles.
    vmem_budget = 8 * 1024 * 1024
    tb = max(1, min(B, vmem_budget // (2 * bytes_per_b)))

    # Keep >= 2 (prefer 4) grid steps when B allows: lets v7x megacore split the
    # rows across both TensorCores and keeps the DMA pipeline full.
    if B >= 4:
        tb = min(tb, max(1, B // 4))
    elif B >= 2:
        tb = min(tb, max(1, B // 2))

    grid = (pl.cdiv(B, tb),)

    out = pl.pallas_call(
        _cls_token_kernel,
        out_shape=jax.ShapeDtypeStruct((B, C, S + 1), dtype),
        grid=grid,
        in_specs=[
            pl.BlockSpec((tb, C, S), lambda b: (b, 0, 0)),
            # Constant index_map: the (C, 1) token block is fetched once and
            # stays resident across all grid steps.
            pl.BlockSpec((C, 1), lambda b: (0, 0)),
        ],
        out_specs=pl.BlockSpec((tb, C, S + 1), lambda b: (b, 0, 0)),
        compiler_params=pltpu.CompilerParams(
            dimension_semantics=("parallel",),
        ),
    )(obs3, tok)

    return out


if __name__ == "__main__":
    key = jax.random.PRNGKey(0)
    k_obs, k_tok = jax.random.split(key)

    # Module equivalent: CLSToken(input_shape=(4, 16, 16))
    B, C, H, W = 2, 4, 16, 16
    obs = jax.random.normal(k_obs, (B, C, H, W), dtype=jnp.float32)
    token = jax.random.normal(k_tok, (C, 1), dtype=jnp.float32)  # nn.Parameter(torch.randn(C, 1))

    out = cls_token_forward(obs, token)
    out = jax.block_until_ready(out)

    # Reference (pure JAX) — same semantics as torch.cat([obs.flatten(-2),
    # token.expand(B, C, 1)], dim=-1).
    ref = jnp.concatenate(
        [obs.reshape(B, C, H * W), jnp.broadcast_to(token[None], (B, C, 1))], axis=-1
    )
    assert out.shape == (B, C, H * W + 1), out.shape
    assert jnp.allclose(out, ref), "mismatch vs reference"

    print("KERNEL_OK")
</pallas_src>

<mosaic_0001>
module attributes {stable_mosaic.version = 11 : i64} {
  func.func @_cls_token_kernel(%arg0: i32, %arg1: memref<1x4x256xf32, #tpu.memory_space<vmem>>, %arg2: memref<4x1xf32, #tpu.memory_space<vmem>>, %arg3: memref<1x4x257xf32, #tpu.memory_space<vmem>>) attributes {dimension_semantics = [#tpu.dimension_semantics<parallel>], iteration_bounds = array<i64: 2>, scalar_prefetch = 0 : i64, scratch_operands = 0 : i64, tpu.core_type = #tpu.core_type<tc>, window_params = [{transform_indices = @transform_0, window_bounds = array<i64: 1, 4, 256>}, {pipeline_mode = #tpu.pipeline_mode<synchronous>, transform_indices = @transform_1, window_bounds = array<i64: 4, 1>}, {transform_indices = @transform_2, window_bounds = array<i64: 1, 4, 257>}]} {
    %c0 = arith.constant 0 : index
    %c0_0 = arith.constant 0 : index
    %c0_1 = arith.constant 0 : index
    %0 = vector.load %arg1[%c0, %c0_0, %c0_1] : memref<1x4x256xf32, #tpu.memory_space<vmem>>, vector<1x4x256xf32>
    %c0_2 = arith.constant 0 : index
    %c0_3 = arith.constant 0 : index
    %c0_4 = arith.constant 0 : index
    %1 = vector.load %arg3[%c0_2, %c0_3, %c0_4] : memref<1x4x257xf32, #tpu.memory_space<vmem>>, vector<1x4x256xf32>
    tpu.vector_store %arg3[%c0_2, %c0_3, %c0_4], %0 {strides = array<i32>} : memref<1x4x257xf32, #tpu.memory_space<vmem>>, vector<1x4x256xf32>,
    %c0_5 = arith.constant 0 : index
    %c0_6 = arith.constant 0 : index
    %2 = vector.load %arg2[%c0_5, %c0_6] : memref<4x1xf32, #tpu.memory_space<vmem>>, vector<4x1xf32>
    %3 = vector.shape_cast %2 : vector<4x1xf32> to vector<1x4x1xf32>
    %c0_7 = arith.constant 0 : index
    %c0_8 = arith.constant 0 : index
    %c256 = arith.constant 256 : index
    %4 = vector.load %arg3[%c0_7, %c0_8, %c256] : memref<1x4x257xf32, #tpu.memory_space<vmem>>, vector<1x4x1xf32>
    tpu.vector_store %arg3[%c0_7, %c0_8, %c256], %3 {strides = array<i32>} : memref<1x4x257xf32, #tpu.memory_space<vmem>>, vector<1x4x1xf32>,
    return
  }
  func.func @transform_0(%arg0: i32) -> (i32, i32, i32) {
    %c0_i32 = arith.constant 0 : i32
    %c0_i32_0 = arith.constant 0 : i32
    %c0_i32_1 = arith.constant 0 : i32
    return %arg0, %c0_i32, %c0_i32_0 : i32, i32, i32
  }
  func.func @transform_1(%arg0: i32) -> (i32, i32) {
    %c0_i32 = arith.constant 0 : i32
    %c0_i32_0 = arith.constant 0 : i32
    %c0_i32_1 = arith.constant 0 : i32
    return %c0_i32, %c0_i32_0 : i32, i32
  }
  func.func @transform_2(%arg0: i32) -> (i32, i32, i32) {
    %c0_i32 = arith.constant 0 : i32
    %c0_i32_0 = arith.constant 0 : i32
    %c0_i32_1 = arith.constant 0 : i32
    return %arg0, %c0_i32, %c0_i32_0 : i32, i32, i32
  }
}

</mosaic_0001>

<bundles_post_ra>
// kernel: tpu_custom_call.1
= control target key start
LH: loop header
LB: loop body
LE: loop exit
PB: predicated region body
PF: predicated region fallthrough
CT: control target
= control target key end

     0   :  { %7 = vsyncpa [#allocation3], 0  ;;  %s590_s0 = inlined_call_operand.hbm [shape: f32[2,4,256], index: 0, kind: input, shape index: {}]   ;;  %s591_s1 = inlined_call_operand.vmem [shape: f32[4,1], index: 1, kind: input, shape index: {}]   ;;  %s592_s2 = inlined_call_operand.hbm [shape: f32[2,4,257], index: 2, kind: output, shape index: {}]  }
   0x1   :  { %9 = vsyncpa [#allocation3 + $0x1], 0 }
   0x2   :  { %10 = vsyncpa [#allocation4], 0 }
   0x3   :  { %12 = vsyncpa [#allocation4 + $0x1], 0  ;;  %s425_s9 = smov 0   ;;  %s427_s10 = smov 0  }
   0x4   :  { %s429_s11 = smov 0   ;;  %s431_s12 = smov 0  }
   0x5 LB: > { %s446_s13 = sadd.s32 4294967295, %s406_s12   ;;  %s250_s14 = sadd.s32 4294967294, %s406_s12   ;;  %s406_s12 = sphi %s431_s12, %s607_s12   ;;  %s402_s11 = sphi %s429_s11, %s606_s11   ;;  %s398_s10 = sphi %s427_s10, %s605_s10   ;;  %s394_s9 = sphi %s425_s9, %s604_s9  }
   0x6   : > { %s450_s15 = sadd.s32 1, %s406_s12   ;;  %s25_s16 = sadd.s32 1, %s402_s11 }
   0x7   : > { %s22_s17 = ssub.s32 %s406_s12, %s450_s15  ;;  %p32_p0 = scmp.ne.s32.totalorder %s402_s11, %s398_s10 }
   0x8   : > { %p23_p1 = scmp.eq.s32.totalorder %s22_s17, 0  ;;  %p33_p2 = scmp.eq.s32.totalorder %s406_s12, 0 }
   0x9   : > { %p38_p3 = scmp.ne.s32.totalorder %s398_s10, %s394_s9  ;;  %p39_p4 = scmp.eq.s32.totalorder %s446_s13, 0 }
   0xa   : > { %s462_s18 = scalar_select %p23_p1, %s402_s11, %s25_s16  }
   0xb   : > { %p464_p5 = por %p33_p2, %p32_p0  ;;  %p468_p6 = por %p39_p4, %p38_p3 }
   0xc   : > { %p83_p7 = scmp.eq.s32.totalorder %s446_s13, 1  ;;  %p89_p8 = scmp.eq.s32.totalorder %s250_s14, 1 }
   0xd   : > { %p276_p10 = scmp.lt.s32.totalorder %s406_s12, 2  ;;  %s112_s23 = sand.u32 1, %s402_s11  }
   0xe   : > { %p475_p11 = por %p83_p7, %p32_p0  ;;  %p479_p12 = por %p89_p8, %p38_p3 }
   0xf   : > { %s261_s24 = sshll.u32 %s406_s12, 7  ;;  %s253_s25 = sshll.u32 %s112_s23, 3 }
  0x10   : > { %s596_s21 = scalar_select %p475_p11, 1, 0 }
  0x11   : > { %s597_s22 = scalar_select %p479_p12, 1, 0 }
  0x12   : > { %s488_s28 = scalar_lea.hbm %s590_s0, %s261_s24  ;;  %s116_s29 = scalar_lea.vmem [#allocation2], %s253_s25 }
  0x13   : > { %s124_s30 = sshll.u32 %s116_s29, 4  ;;  %p492_p13 = pnand %p276_p10, %p464_p5  ;;  %s496_s30 = int_to_ptr.vmem [resolvable:$true] %s124_s30 }
  0x14   : > { %s113_s4 = scalar_lea.sflag [#allocation3], %s112_s23  ;;  %s310_s5 = scalar_lea.hbm %s488_s28, 128 }
  0x15   : > { %p311_p2 = scmp.ne.s32.totalorder %s488_s28, %s310_s5  ;;  %p312_p3 = pneg %p492_p13 }
  0x16   : > { %s315_s8 = scalar_lea.hbm %s590_s0, 256  ;;  %p316_p5 = scmp.lt.u32.totalorder %s488_s28, %s590_s0 }
  0x17   : > { %p313_p4 = pnand %p312_p3, %p311_p2  ;;  %p317_p8 = scmp.lt.u32.totalorder %s315_s8, %s310_s5 }
  0x18   : > { %p319_p9 = scmp.lt.u32.totalorder %s310_s5, %s488_s28 }
  0x19   : > { %p314_p7 = pneg %p313_p4  ;;  %p318_p10 = por %p317_p8, %p316_p5 }
  0x1b   : > { %p320_p0 = por %p319_p9, %p318_p10 }
  0x1d   : > { %p321_p1 = pnand %p320_p0, %p314_p7 }
  0x1f   : > { %324 = shalt.err (!%p321_p1)
}
  0x20   : > { %s325_s17 = scalar_lea.vmem %s496_s30, 128  ;;  %s408_s19 = smov [#allocation2]  }
  0x21   : > { %p326_p2 = scmp.ne.s32.totalorder %s496_s30, %s325_s17  ;;  %s330_s23 = sshll.u32 %s408_s19, 4  ;;  %s331_s23 = int_to_ptr.vmem [resolvable:$false] %s330_s23 }
  0x22   : > { %s332_s24 = scalar_lea.vmem %s331_s23, 256  ;;  %p333_p11 = scmp.lt.s32.totalorder %s496_s30, %s331_s23 }
  0x23   : > { %p328_p4 = pnand %p326_p2, %p312_p3  ;;  %p334_p5 = scmp.lt.s32.totalorder %s332_s24, %s325_s17 }
  0x25   : > { %p329_p12 = pneg %p328_p4  ;;  %p335_p8 = por %p334_p5, %p333_p11 }
  0x27   : > { %p336_p9 = pnand %p335_p8, %p329_p12 }
  0x29   : > { %339 = shalt.err (!%p336_p9)
}
  0x2a   : > { %271 = dma.hbm_to_vmem [thread:$0]  (!%p492_p13), %s488_s28, 128, %s496_s30, %s113_s4  }
  0x2b   : > { %p599_p0 = scmp.lt.s32.totalorder %s406_s12, 3  ;;  %p600_p1 = scmp.ge.s32.totalorder %s406_s12, 1 }
  0x2d   : > { %p130_p3 = pnand %p600_p1, %p599_p0 }
  0x2e   : > { %s530_s25 = sand.u32 (!%p130_p3), 1, %s398_s10  }
  0x2f   : > { %133 = sbr.rel (%p130_p3) target bundleno = 81 (0x51), region = 28  ;;  %s257_s26 = sshll.u32 (!%p130_p3), %s530_s25, 3 }
  0x30   : > { %s136_s27 = scalar_lea.sflag (!%p130_p3), [#allocation3], %s530_s25  ;;  %s139_s29 = scalar_lea.vmem (!%p130_p3), [#allocation2], %s257_s26 }
  0x36   : > { %385 = dma.done.wait (%p468_p6), %s136_s27, 128  }
  0x37   : > { %387 = vsyncadd (%p468_p6), %s136_s27, 4294967168  ;;  %s262_s28 = smul.u32 12, %s530_s25  ;;  %vm163_vm0 = vcmask 3072   ;;  %v160_v0 = vld [vmem:[%s139_s29] sm:$0xff]  ;;  %p601_p11 = scmp.ne.s32.totalorder %s596_s21, 0 }
  0x38   : > { %s263_s30 = smul.u32 192, %s446_s13  ;;  %v162_v1 = vld [vmem:[%s591_s1] sm:$0xf]  ;;  %s166_s13 = scalar_lea.sflag [#allocation4], %s530_s25 }
  0x39   : > { %s159_s3 = scalar_lea.vmem [#allocation5], %s262_s28  ;;  %s409_s16 = smov [#allocation5]  }
  0x3a   : > { %s180_s4 = sshll.u32 %s159_s3, 4  ;;  %s545_s7 = scalar_lea.hbm %s592_s2, %s263_s30  ;;  %161 = vst [vmem:[%s159_s3] sm:$0xff] %v160_v0  ;;  %164 = vst.msk [vmem:[%s159_s3 + $0x8] sm:$0xf] %vm163_vm0, %v162_v1  ;;  %s540_s4 = int_to_ptr.vmem [resolvable:$true] %s180_s4 }
  0x3b   : > { %s340_s14 = scalar_lea.vmem %s540_s4, 192  ;;  %s344_s17 = sshll.u32 %s409_s16, 4  ;;  %s345_s17 = int_to_ptr.vmem [resolvable:$false] %s344_s17 }
  0x3c   : > { %p341_p6 = scmp.ne.s32.totalorder %s540_s4, %s340_s14  ;;  %s346_s19 = scalar_lea.vmem %s345_s17, 384 }
  0x3d   : > { %p347_p7 = scmp.lt.s32.totalorder %s540_s4, %s345_s17  ;;  %p348_p10 = scmp.lt.s32.totalorder %s346_s19, %s340_s14 }
  0x3e   : > { %p342_p12 = pnand %p341_p6, %p601_p11 }
  0x3f   : > { %p349_p2 = por %p348_p10, %p347_p7 }
  0x40   : > { %p343_p13 = pneg %p342_p12 }
  0x42   : > { %p350_p4 = pnand %p349_p2, %p343_p13 }
  0x44   : > { %353 = shalt.err (!%p350_p4)
}
  0x45   : > { %s354_s23 = scalar_lea.hbm %s545_s7, 192  ;;  %s358_s26 = scalar_lea.hbm %s592_s2, 384 }
  0x46   : > { %p355_p5 = scmp.ne.s32.totalorder %s545_s7, %s354_s23  ;;  %p359_p0 = scmp.lt.u32.totalorder %s545_s7, %s592_s2 }
  0x47   : > { %p360_p1 = scmp.lt.u32.totalorder %s358_s26, %s354_s23  ;;  %p362_p6 = scmp.lt.u32.totalorder %s354_s23, %s545_s7 }
  0x48   : > { %p356_p8 = pnand %p355_p5, %p601_p11 }
  0x49   : > { %p361_p3 = por %p360_p1, %p359_p0 }
  0x4a   : > { %p357_p9 = pneg %p356_p8 }
  0x4b   : > { %p363_p12 = por %p362_p6, %p361_p3 }
  0x4d   : > { %p364_p13 = pnand %p363_p12, %p357_p9 }
  0x4f   : > { %367 = shalt.err (!%p364_p13)
}
  0x50   : > { %266 = dma.vmem_to_hbm [thread:$0]  (%p601_p11), %s540_s4, 192, %s545_s7, %s166_s13  }
  0x51 PF: > { %s192_s28 = sand.u32 1, %s394_s9   ;;  %p602_p7 = scmp.ne.s32.totalorder %s597_s22, 0 }
  0x52   : > { %p603_p10 = scmp.ge.s32.totalorder %s406_s12, 2  ;;  %s193_s30 = scalar_lea.sflag [#allocation4], %s192_s28 }
  0x54   : > { %p273_p2 = pnand %p603_p10, %p602_p7 }
  0x56   : > { %389 = dma.done.wait (!%p273_p2), %s193_s30, 192  }
  0x57   : > { %391 = vsyncadd (!%p273_p2), %s193_s30, 4294967104  ;;  %p15_p4 = scmp.ge.s32.totalorder %s450_s15, 4   ;;  %s604_s9 = smov %s398_s10 }
  0x58   : > { %s605_s10 = smov %s402_s11  ;;  %s606_s11 = smov %s462_s18 }
  0x59   : > { %s607_s12 = smov %s450_s15  ;;  %17 = sbr.rel (!%p15_p4) target bundleno = 5 (0x5), region = 73 }
  0x60   :  { %198 = vsyncpa [#allocation3], 1 }
  0x61   :  { %200 = vsyncpa [#allocation3 + $0x1], 1 }
  0x62   :  { %201 = vsyncpa [#allocation4], 1 }
  0x63   :  { %203 = vsyncpa [#allocation4 + $0x1], 1 }

</bundles_post_ra>
